<compile_context>
chip_gen: v5e
topology: v5e:2x2
jax: 0.10.0
libtpu: 0.0.40
codegen_flags: <defaults>
</compile_context>

<pallas_src>
import functools

import jax
import jax.numpy as jnp
from jax import lax
from jax.experimental import pallas as pl
from jax.experimental.pallas import tpu as pltpu

EPS = 1e-5
LEAKY_SLOPE = 0.01  # nn.LeakyReLU default


def _round_up(x, m):
    return ((x + m - 1) // m) * m


@functools.partial(jax.jit, static_argnames=("kernel_size", "stride", "padding"))
def encoder_forward(x, params, kernel_size, stride, padding):
    B, Cin, H, W, _ = x.shape
    kh, kw = kernel_size
    sh, sw = stride
    ph, pw = padding
    Cout = params["w_re"].shape[0]
    C = 2 * Cin          # complex folded into channels
    C2 = 2 * Cout        # [real rows | imag rows]

    OH = (H + 2 * ph - kh) // sh + 1
    OW = (W + 2 * pw - kw) // sw + 1
    M = B * OH * OW      # BN statistic count

    # ---------------- space-to-depth preprocessing (single XLA pass) ----------
    Hp, Wp = H + 2 * ph, W + 2 * pw
    eh, ew = (-Hp) % sh, (-Wp) % sw                  # pad to stride multiples
    Hs, Ws = (Hp + eh) // sh, (Wp + ew) // sw
    KH2, KW2 = (kh - 1) // sh + 1, (kw - 1) // sw + 1
    T = KH2 * KW2                                    # remaining (stride-1) taps
    G = sh * sw * C                                  # s2d channel count

    NC = _round_up(OH * Ws, 128)                     # output lanes computed/step
    max_shift = (KH2 - 1) * Ws + (KW2 - 1)
    NL = _round_up(max(NC + max_shift, Hs * Ws), 128)  # input lanes/step

    # fold complex into channels -> [B, H, W, 2*Cin], cast to bf16 once
    xc = x.transpose(0, 2, 3, 1, 4).reshape(B, H, W, C).astype(jnp.bfloat16)
    xp = jnp.pad(xc, ((0, 0), (ph, ph + eh), (pw, pw + ew), (0, 0)))
    # s2d + channel-major transpose -> [B, G, Hs*Ws]; G order = (p, q, cin, comp)
    xT = (xp.reshape(B, Hs, sh, Ws, sw, C)
            .transpose(0, 2, 4, 5, 1, 3)
            .reshape(B, G, Hs * Ws))
    xT = jnp.pad(xT, ((0, 0), (0, 0), (0, NL - Hs * Ws)))

    # ---------------- block weights per s2d tap: w_taps[t, c2, g] -------------
    wr_t = params["w_re"].transpose(2, 3, 0, 1)      # [kh, kw, Cout, Cin]
    wi_t = params["w_im"].transpose(2, 3, 0, 1)
    rows_real = jnp.stack([wr_t, -wi_t], axis=-1)    # real-output rows: wr*x_re - wi*x_im
    rows_imag = jnp.stack([wi_t, wr_t], axis=-1)     # imag-output rows: wi*x_re + wr*x_im
    WT = jnp.concatenate([rows_real, rows_imag], axis=2)        # [kh, kw, C2, Cin, 2]
    WT = WT.reshape(kh, kw, C2, C)
    WT = jnp.pad(WT, ((0, KH2 * sh - kh), (0, KW2 * sw - kw), (0, 0), (0, 0)))
    w_taps = (WT.reshape(KH2, sh, KW2, sw, C2, C)
                .transpose(0, 2, 4, 1, 3, 5)
                .reshape(T, C2, G)
                .astype(jnp.bfloat16))
    # NOTE: conv bias (b_re/b_im) intentionally omitted; it cancels under
    # batch-statistic BatchNorm.

    shifts = tuple(di * Ws + dj for di in range(KH2) for dj in range(KW2))

    # valid-lane mask: lane n -> output position (r, c) = (n // Ws, n % Ws)
    lane = jnp.arange(NC)
    mask = (((lane // Ws) < OH) & ((lane % Ws) < OW)).astype(jnp.float32)[None, :]

    # ---------------- kernel 1: implicit-GEMM complex conv + stats ------------
    def cconv_kernel(x_ref, w_ref, m_ref, o_ref, sum_ref, sq_ref):
        xv = x_ref[0]                                 # [G, NL] bf16
        acc = jnp.zeros((C2, NC), jnp.float32)
        for t in range(T):                            # static tap loop
            s = shifts[t]
            acc += jnp.dot(w_ref[t], xv[:, s:s + NC],
                           preferred_element_type=jnp.float32)
        o_ref[0] = acc.astype(o_ref.dtype)            # bf16, lane-dense store
        am = acc * m_ref[...]                         # mask invalid lanes
        sum_ref[0] = jnp.sum(am, axis=1, keepdims=True)
        sq_ref[0] = jnp.sum(am * acc, axis=1, keepdims=True)

    conv_bytes = (B * G * NL * 2 + T * C2 * G * 2 + NC * 4
                  + B * C2 * NC * 2 + 2 * B * C2 * 4)
    conv_out, psum, psq = pl.pallas_call(
        cconv_kernel,
        out_shape=(jax.ShapeDtypeStruct((B, C2, NC), jnp.bfloat16),
                   jax.ShapeDtypeStruct((B, C2, 1), jnp.float32),
                   jax.ShapeDtypeStruct((B, C2, 1), jnp.float32)),
        grid=(B,),
        in_specs=[pl.BlockSpec((1, G, NL), lambda b: (b, 0, 0)),
                  pl.BlockSpec((T, C2, G), lambda b: (0, 0, 0)),
                  pl.BlockSpec((1, NC), lambda b: (0, 0))],
        out_specs=(pl.BlockSpec((1, C2, NC), lambda b: (b, 0, 0)),
                   pl.BlockSpec((1, C2, 1), lambda b: (b, 0, 0)),
                   pl.BlockSpec((1, C2, 1), lambda b: (b, 0, 0))),
        compiler_params=pltpu.CompilerParams(dimension_semantics=("parallel",)),
        cost_estimate=pl.CostEstimate(flops=2 * B * T * C2 * G * NC,
                                      transcendentals=0,
                                      bytes_accessed=conv_bytes),
    )(xT, w_taps, mask)

    # ---- finalize batch statistics (biased variance, training-mode BN) -------
    inv_m = jnp.float32(1.0 / M)
    mean = jnp.sum(psum, axis=0) * inv_m                       # [C2, 1]
    var = jnp.maximum(jnp.sum(psq, axis=0) * inv_m - mean * mean, 0.0)
    gamma = jnp.concatenate([params["gamma_re"], params["gamma_im"]])[:, None]
    beta = jnp.concatenate([params["beta_re"], params["beta_im"]])[:, None]
    scale = gamma * lax.rsqrt(var + EPS)
    shift = beta - mean * scale

    # ---------------- kernel 2: BN scale/shift + LeakyReLU (in place) ---------
    def bn_lrelu_kernel(y_ref, sc_ref, sf_ref, o_ref):
        y = y_ref[0].astype(jnp.float32) * sc_ref[...] + sf_ref[...]
        o_ref[0] = jnp.where(y >= 0, y, LEAKY_SLOPE * y).astype(o_ref.dtype)

    bn_bytes = 2 * B * C2 * NC * 2 + 2 * C2 * 4
    y = pl.pallas_call(
        bn_lrelu_kernel,
        out_shape=jax.ShapeDtypeStruct((B, C2, NC), jnp.bfloat16),
        grid=(B,),
        in_specs=[pl.BlockSpec((1, C2, NC), lambda b: (b, 0, 0)),
                  pl.BlockSpec((C2, 1), lambda b: (0, 0)),
                  pl.BlockSpec((C2, 1), lambda b: (0, 0))],
        out_specs=pl.BlockSpec((1, C2, NC), lambda b: (b, 0, 0)),
        input_output_aliases={0: 0},
        compiler_params=pltpu.CompilerParams(dimension_semantics=("parallel",)),
        cost_estimate=pl.CostEstimate(flops=3 * B * C2 * NC,
                                      transcendentals=0,
                                      bytes_accessed=bn_bytes),
    )(conv_out, scale, shift)

    # ---- back to the PyTorch layout [B, Cout, OH, OW, 2] (one XLA relayout) ---
    y = y[:, :, :OH * Ws].reshape(B, C2, OH, Ws)[:, :, :, :OW]
    out = (y.reshape(B, 2, Cout, OH, OW)
             .transpose(0, 2, 3, 4, 1)
             .astype(jnp.float32))
    return out


# ------------------------------------------------------------------------------
# Pure-JAX reference (bf16-rounded conv operands to match kernel precision)
# ------------------------------------------------------------------------------
def encoder_reference(x, params, kernel_size, stride, padding):
    kh, kw = kernel_size
    sh, sw = stride
    ph, pw = padding
    xb = x.astype(jnp.bfloat16).astype(jnp.float32)
    wr = params["w_re"].astype(jnp.bfloat16).astype(jnp.float32)
    wi = params["w_im"].astype(jnp.bfloat16).astype(jnp.float32)
    conv = functools.partial(
        lax.conv_general_dilated,
        window_strides=(sh, sw), padding=((ph, ph), (pw, pw)),
        dimension_numbers=("NCHW", "OIHW", "NCHW"),
        precision=lax.Precision.HIGHEST)
    x_re, x_im = xb[..., 0], xb[..., 1]
    br = params["b_re"][None, :, None, None]
    bi = params["b_im"][None, :, None, None]
    real = conv(x_re, wr) - conv(x_im, wi) + (br - bi)
    imag = conv(x_im, wr) + conv(x_re, wi) + (br + bi)

    def bn(v, gamma, beta):
        mu = jnp.mean(v, axis=(0, 2, 3), keepdims=True)
        var = jnp.mean((v - mu) ** 2, axis=(0, 2, 3), keepdims=True)
        return ((v - mu) * lax.rsqrt(var + EPS) * gamma[None, :, None, None]
                + beta[None, :, None, None])

    real = bn(real, params["gamma_re"], params["beta_re"])
    imag = bn(imag, params["gamma_im"], params["beta_im"])
    yy = jnp.stack([real, imag], axis=-1)
    return jnp.where(yy >= 0, yy, LEAKY_SLOPE * yy)


# ------------------------------------------------------------------------------
# Deterministic parameter construction (shapes per the module __init__)
# ------------------------------------------------------------------------------
def make_params(key, in_channels, out_channels, kernel_size):
    kh, kw = kernel_size
    fan_in = in_channels * kh * kw
    scale = 1.0 / jnp.sqrt(fan_in)
    ks = jax.random.split(key, 8)
    shape_w = (out_channels, in_channels, kh, kw)
    return {
        "w_re": jax.random.uniform(ks[0], shape_w, jnp.float32, -scale, scale),
        "w_im": jax.random.uniform(ks[1], shape_w, jnp.float32, -scale, scale),
        # biases kept for module fidelity; they cancel under batch-stat BN.
        "b_re": jax.random.uniform(ks[2], (out_channels,), jnp.float32, -scale, scale),
        "b_im": jax.random.uniform(ks[3], (out_channels,), jnp.float32, -scale, scale),
        "gamma_re": jnp.ones((out_channels,), jnp.float32)
                    + 0.1 * jax.random.normal(ks[4], (out_channels,), jnp.float32),
        "beta_re": 0.1 * jax.random.normal(ks[5], (out_channels,), jnp.float32),
        "gamma_im": jnp.ones((out_channels,), jnp.float32)
                    + 0.1 * jax.random.normal(ks[6], (out_channels,), jnp.float32),
        "beta_im": 0.1 * jax.random.normal(ks[7], (out_channels,), jnp.float32),
    }


if __name__ == "__main__":
    # Encoder(in_channels=4, out_channels=8, kernel_size=(3,3), stride=(2,2),
    #         padding=None -> (1,1), complex=True)
    B, Cin, H, W = 2, 4, 16, 16
    Cout = 8
    kernel_size = (3, 3)
    stride = (2, 2)
    padding = tuple((k - 1) // 2 for k in kernel_size)

    key = jax.random.PRNGKey(0)
    kx, kp = jax.random.split(key)
    x = jax.random.normal(kx, (B, Cin, H, W, 2), jnp.float32)
    params = make_params(kp, Cin, Cout, kernel_size)

    out = encoder_forward(x, params, kernel_size, stride, padding)
    out = jax.block_until_ready(out)
    assert out.shape == (B, Cout, H // stride[0], W // stride[1], 2), out.shape
    assert bool(jnp.all(jnp.isfinite(out)))

    ref = encoder_reference(x, params, kernel_size, stride, padding)
    max_err = float(jnp.max(jnp.abs(out - ref)))
    assert bool(jnp.allclose(out, ref, atol=5e-2, rtol=5e-2)), max_err
    print("KERNEL_OK")
</pallas_src>

<mosaic_0001>
module attributes {stable_mosaic.version = 11 : i64} {
  func.func @cconv_kernel(%arg0: i32, %arg1: memref<1x32x256xbf16, #tpu.memory_space<vmem>>, %arg2: memref<4x16x32xbf16, #tpu.memory_space<vmem>>, %arg3: memref<1x128xf32, #tpu.memory_space<vmem>>, %arg4: memref<1x16x128xbf16, #tpu.memory_space<vmem>>, %arg5: memref<1x16x1xf32, #tpu.memory_space<vmem>>, %arg6: memref<1x16x1xf32, #tpu.memory_space<vmem>>) attributes {dimension_semantics = [#tpu.dimension_semantics<parallel>], iteration_bounds = array<i64: 2>, scalar_prefetch = 0 : i64, scratch_operands = 0 : i64, tpu.core_type = #tpu.core_type<tc>, window_params = [{transform_indices = @transform_0, window_bounds = array<i64: 1, 32, 256>}, {pipeline_mode = #tpu.pipeline_mode<synchronous>, transform_indices = @transform_1, window_bounds = array<i64: 4, 16, 32>}, {pipeline_mode = #tpu.pipeline_mode<synchronous>, transform_indices = @transform_2, window_bounds = array<i64: 1, 128>}, {transform_indices = @transform_3, window_bounds = array<i64: 1, 16, 128>}, {transform_indices = @transform_4, window_bounds = array<i64: 1, 16, 1>}, {transform_indices = @transform_5, window_bounds = array<i64: 1, 16, 1>}]} {
    %c0 = arith.constant 0 : index
    %c0_0 = arith.constant 0 : index
    %c0_1 = arith.constant 0 : index
    %0 = vector.load %arg1[%c0, %c0_0, %c0_1] : memref<1x32x256xbf16, #tpu.memory_space<vmem>>, vector<1x32x256xbf16>
    %1 = vector.shape_cast %0 : vector<1x32x256xbf16> to vector<32x256xbf16>
    %cst = arith.constant 0.000000e+00 : f32
    %2 = vector.broadcast %cst : f32 to vector<16x128xf32>
    %c0_2 = arith.constant 0 : index
    %c0_3 = arith.constant 0 : index
    %c0_4 = arith.constant 0 : index
    %3 = vector.load %arg2[%c0_2, %c0_3, %c0_4] : memref<4x16x32xbf16, #tpu.memory_space<vmem>>, vector<1x16x32xbf16>
    %4 = vector.shape_cast %3 : vector<1x16x32xbf16> to vector<16x32xbf16>
    %5 = vector.extract_strided_slice %1 {offsets = [0, 0], sizes = [32, 128], strides = [1, 1]} : vector<32x256xbf16> to vector<32x128xbf16>
    %cst_5 = arith.constant dense<0.000000e+00> : vector<16x128xf32>
    %6 = tpu.matmul %4, %5, %cst_5 {dimension_numbers = #tpu.dot_dimension_numbers<[1], [0], [0], [1], [0, 0, 1, 1], [], []>} : vector<16x32xbf16>, vector<32x128xbf16>, vector<16x128xf32> -> vector<16x128xf32>
    %7 = arith.addf %2, %6 : vector<16x128xf32>
    %c1 = arith.constant 1 : index
    %c0_6 = arith.constant 0 : index
    %c0_7 = arith.constant 0 : index
    %8 = vector.load %arg2[%c1, %c0_6, %c0_7] : memref<4x16x32xbf16, #tpu.memory_space<vmem>>, vector<1x16x32xbf16>
    %9 = vector.shape_cast %8 : vector<1x16x32xbf16> to vector<16x32xbf16>
    %10 = vector.extract_strided_slice %1 {offsets = [0, 1], sizes = [32, 128], strides = [1, 1]} : vector<32x256xbf16> to vector<32x128xbf16>
    %cst_8 = arith.constant dense<0.000000e+00> : vector<16x128xf32>
    %11 = tpu.matmul %9, %10, %cst_8 {dimension_numbers = #tpu.dot_dimension_numbers<[1], [0], [0], [1], [0, 0, 1, 1], [], []>} : vector<16x32xbf16>, vector<32x128xbf16>, vector<16x128xf32> -> vector<16x128xf32>
    %12 = arith.addf %7, %11 : vector<16x128xf32>
    %c2 = arith.constant 2 : index
    %c0_9 = arith.constant 0 : index
    %c0_10 = arith.constant 0 : index
    %13 = vector.load %arg2[%c2, %c0_9, %c0_10] : memref<4x16x32xbf16, #tpu.memory_space<vmem>>, vector<1x16x32xbf16>
    %14 = vector.shape_cast %13 : vector<1x16x32xbf16> to vector<16x32xbf16>
    %15 = vector.extract_strided_slice %1 {offsets = [0, 9], sizes = [32, 128], strides = [1, 1]} : vector<32x256xbf16> to vector<32x128xbf16>
    %cst_11 = arith.constant dense<0.000000e+00> : vector<16x128xf32>
    %16 = tpu.matmul %14, %15, %cst_11 {dimension_numbers = #tpu.dot_dimension_numbers<[1], [0], [0], [1], [0, 0, 1, 1], [], []>} : vector<16x32xbf16>, vector<32x128xbf16>, vector<16x128xf32> -> vector<16x128xf32>
    %17 = arith.addf %12, %16 : vector<16x128xf32>
    %c3 = arith.constant 3 : index
    %c0_12 = arith.constant 0 : index
    %c0_13 = arith.constant 0 : index
    %18 = vector.load %arg2[%c3, %c0_12, %c0_13] : memref<4x16x32xbf16, #tpu.memory_space<vmem>>, vector<1x16x32xbf16>
    %19 = vector.shape_cast %18 : vector<1x16x32xbf16> to vector<16x32xbf16>
    %20 = vector.extract_strided_slice %1 {offsets = [0, 10], sizes = [32, 128], strides = [1, 1]} : vector<32x256xbf16> to vector<32x128xbf16>
    %cst_14 = arith.constant dense<0.000000e+00> : vector<16x128xf32>
    %21 = tpu.matmul %19, %20, %cst_14 {dimension_numbers = #tpu.dot_dimension_numbers<[1], [0], [0], [1], [0, 0, 1, 1], [], []>} : vector<16x32xbf16>, vector<32x128xbf16>, vector<16x128xf32> -> vector<16x128xf32>
    %22 = arith.addf %17, %21 : vector<16x128xf32>
    %23 = arith.truncf %22 : vector<16x128xf32> to vector<16x128xbf16>
    %c0_15 = arith.constant 0 : index
    %c0_16 = arith.constant 0 : index
    %c0_17 = arith.constant 0 : index
    %24 = vector.load %arg4[%c0_15, %c0_16, %c0_17] : memref<1x16x128xbf16, #tpu.memory_space<vmem>>, vector<1x16x128xbf16>
    %25 = vector.shape_cast %24 : vector<1x16x128xbf16> to vector<16x128xbf16>
    %26 = vector.shape_cast %23 : vector<16x128xbf16> to vector<1x16x128xbf16>
    tpu.vector_store %arg4[%c0_15, %c0_16, %c0_17], %26 {strides = array<i32>} : memref<1x16x128xbf16, #tpu.memory_space<vmem>>, vector<1x16x128xbf16>,
    %c0_18 = arith.constant 0 : index
    %c0_19 = arith.constant 0 : index
    %27 = vector.load %arg3[%c0_18, %c0_19] : memref<1x128xf32, #tpu.memory_space<vmem>>, vector<1x128xf32>
    %28 = vector.broadcast %27 : vector<1x128xf32> to vector<16x128xf32>
    %29 = arith.mulf %22, %28 : vector<16x128xf32>
    %cst_20 = arith.constant dense<0.000000e+00> : vector<16xf32>
    %30 = vector.multi_reduction <add>, %29, %cst_20 [1] : vector<16x128xf32> to vector<16xf32>
    %31 = vector.shape_cast %30 : vector<16xf32> to vector<16x1xf32>
    %c0_21 = arith.constant 0 : index
    %c0_22 = arith.constant 0 : index
    %c0_23 = arith.constant 0 : index
    %32 = vector.load %arg5[%c0_21, %c0_22, %c0_23] : memref<1x16x1xf32, #tpu.memory_space<vmem>>, vector<1x16x1xf32>
    %33 = vector.shape_cast %32 : vector<1x16x1xf32> to vector<16x1xf32>
    %34 = vector.shape_cast %31 : vector<16x1xf32> to vector<1x16x1xf32>
    tpu.vector_store %arg5[%c0_21, %c0_22, %c0_23], %34 {strides = array<i32>} : memref<1x16x1xf32, #tpu.memory_space<vmem>>, vector<1x16x1xf32>,
    %35 = arith.mulf %29, %22 : vector<16x128xf32>
    %cst_24 = arith.constant dense<0.000000e+00> : vector<16xf32>
    %36 = vector.multi_reduction <add>, %35, %cst_24 [1] : vector<16x128xf32> to vector<16xf32>
    %37 = vector.shape_cast %36 : vector<16xf32> to vector<16x1xf32>
    %c0_25 = arith.constant 0 : index
    %c0_26 = arith.constant 0 : index
    %c0_27 = arith.constant 0 : index
    %38 = vector.load %arg6[%c0_25, %c0_26, %c0_27] : memref<1x16x1xf32, #tpu.memory_space<vmem>>, vector<1x16x1xf32>
    %39 = vector.shape_cast %38 : vector<1x16x1xf32> to vector<16x1xf32>
    %40 = vector.shape_cast %37 : vector<16x1xf32> to vector<1x16x1xf32>
    tpu.vector_store %arg6[%c0_25, %c0_26, %c0_27], %40 {strides = array<i32>} : memref<1x16x1xf32, #tpu.memory_space<vmem>>, vector<1x16x1xf32>,
    return
  }
  func.func @transform_0(%arg0: i32) -> (i32, i32, i32) {
    %c0_i32 = arith.constant 0 : i32
    %c0_i32_0 = arith.constant 0 : i32
    %c0_i32_1 = arith.constant 0 : i32
    return %arg0, %c0_i32, %c0_i32_0 : i32, i32, i32
  }
  func.func @transform_1(%arg0: i32) -> (i32, i32, i32) {
    %c0_i32 = arith.constant 0 : i32
    %c0_i32_0 = arith.constant 0 : i32
    %c0_i32_1 = arith.constant 0 : i32
    %c0_i32_2 = arith.constant 0 : i32
    return %c0_i32, %c0_i32_0, %c0_i32_1 : i32, i32, i32
  }
  func.func @transform_2(%arg0: i32) -> (i32, i32) {
    %c0_i32 = arith.constant 0 : i32
    %c0_i32_0 = arith.constant 0 : i32
    %c0_i32_1 = arith.constant 0 : i32
    return %c0_i32, %c0_i32_0 : i32, i32
  }
  func.func @transform_3(%arg0: i32) -> (i32, i32, i32) {
    %c0_i32 = arith.constant 0 : i32
    %c0_i32_0 = arith.constant 0 : i32
    %c0_i32_1 = arith.constant 0 : i32
    return %arg0, %c0_i32, %c0_i32_0 : i32, i32, i32
  }
  func.func @transform_4(%arg0: i32) -> (i32, i32, i32) {
    %c0_i32 = arith.constant 0 : i32
    %c0_i32_0 = arith.constant 0 : i32
    %c0_i32_1 = arith.constant 0 : i32
    return %arg0, %c0_i32, %c0_i32_0 : i32, i32, i32
  }
  func.func @transform_5(%arg0: i32) -> (i32, i32, i32) {
    %c0_i32 = arith.constant 0 : i32
    %c0_i32_0 = arith.constant 0 : i32
    %c0_i32_1 = arith.constant 0 : i32
    return %arg0, %c0_i32, %c0_i32_0 : i32, i32, i32
  }
}

module attributes {stable_mosaic.version = 11 : i64} {
  func.func @bn_lrelu_kernel(%arg0: i32, %arg1: memref<1x16x128xbf16, #tpu.memory_space<vmem>>, %arg2: memref<16x1xf32, #tpu.memory_space<vmem>>, %arg3: memref<16x1xf32, #tpu.memory_space<vmem>>, %arg4: memref<1x16x128xbf16, #tpu.memory_space<vmem>>) attributes {dimension_semantics = [#tpu.dimension_semantics<parallel>], iteration_bounds = array<i64: 2>, scalar_prefetch = 0 : i64, scratch_operands = 0 : i64, tpu.core_type = #tpu.core_type<tc>, window_params = [{transform_indices = @transform_0, window_bounds = array<i64: 1, 16, 128>}, {pipeline_mode = #tpu.pipeline_mode<synchronous>, transform_indices = @transform_1, window_bounds = array<i64: 16, 1>}, {pipeline_mode = #tpu.pipeline_mode<synchronous>, transform_indices = @transform_2, window_bounds = array<i64: 16, 1>}, {transform_indices = @transform_3, window_bounds = array<i64: 1, 16, 128>}]} {
    %c0 = arith.constant 0 : index
    %c0_0 = arith.constant 0 : index
    %c0_1 = arith.constant 0 : index
    %0 = vector.load %arg1[%c0, %c0_0, %c0_1] : memref<1x16x128xbf16, #tpu.memory_space<vmem>>, vector<1x16x128xbf16>
    %1 = vector.shape_cast %0 : vector<1x16x128xbf16> to vector<16x128xbf16>
    %2 = arith.extf %1 : vector<16x128xbf16> to vector<16x128xf32>
    %c0_2 = arith.constant 0 : index
    %c0_3 = arith.constant 0 : index
    %3 = vector.load %arg2[%c0_2, %c0_3] : memref<16x1xf32, #tpu.memory_space<vmem>>, vector<16x1xf32>
    %4 = vector.broadcast %3 : vector<16x1xf32> to vector<16x128xf32>
    %5 = arith.mulf %2, %4 : vector<16x128xf32>
    %c0_4 = arith.constant 0 : index
    %c0_5 = arith.constant 0 : index
    %6 = vector.load %arg3[%c0_4, %c0_5] : memref<16x1xf32, #tpu.memory_space<vmem>>, vector<16x1xf32>
    %7 = vector.broadcast %6 : vector<16x1xf32> to vector<16x128xf32>
    %8 = arith.addf %5, %7 : vector<16x128xf32>
    %cst = arith.constant 0.000000e+00 : f32
    %9 = vector.broadcast %cst : f32 to vector<16x128xf32>
    %10 = arith.cmpf oge, %8, %9 : vector<16x128xf32>
    %cst_6 = arith.constant 0.00999999977 : f32
    %11 = vector.broadcast %cst_6 : f32 to vector<16x128xf32>
    %12 = arith.mulf %11, %8 : vector<16x128xf32>
    %13 = arith.select %10, %8, %12 : vector<16x128xi1>, vector<16x128xf32>
    %14 = arith.truncf %13 : vector<16x128xf32> to vector<16x128xbf16>
    %c0_7 = arith.constant 0 : index
    %c0_8 = arith.constant 0 : index
    %c0_9 = arith.constant 0 : index
    %15 = vector.load %arg4[%c0_7, %c0_8, %c0_9] : memref<1x16x128xbf16, #tpu.memory_space<vmem>>, vector<1x16x128xbf16>
    %16 = vector.shape_cast %15 : vector<1x16x128xbf16> to vector<16x128xbf16>
    %17 = vector.shape_cast %14 : vector<16x128xbf16> to vector<1x16x128xbf16>
    tpu.vector_store %arg4[%c0_7, %c0_8, %c0_9], %17 {strides = array<i32>} : memref<1x16x128xbf16, #tpu.memory_space<vmem>>, vector<1x16x128xbf16>,
    return
  }
  func.func @transform_0(%arg0: i32) -> (i32, i32, i32) {
    %c0_i32 = arith.constant 0 : i32
    %c0_i32_0 = arith.constant 0 : i32
    %c0_i32_1 = arith.constant 0 : i32
    return %arg0, %c0_i32, %c0_i32_0 : i32, i32, i32
  }
  func.func @transform_1(%arg0: i32) -> (i32, i32) {
    %c0_i32 = arith.constant 0 : i32
    %c0_i32_0 = arith.constant 0 : i32
    %c0_i32_1 = arith.constant 0 : i32
    return %c0_i32, %c0_i32_0 : i32, i32
  }
  func.func @transform_2(%arg0: i32) -> (i32, i32) {
    %c0_i32 = arith.constant 0 : i32
    %c0_i32_0 = arith.constant 0 : i32
    %c0_i32_1 = arith.constant 0 : i32
    return %c0_i32, %c0_i32_0 : i32, i32
  }
  func.func @transform_3(%arg0: i32) -> (i32, i32, i32) {
    %c0_i32 = arith.constant 0 : i32
    %c0_i32_0 = arith.constant 0 : i32
    %c0_i32_1 = arith.constant 0 : i32
    return %arg0, %c0_i32, %c0_i32_0 : i32, i32, i32
  }
}

</mosaic_0001>

<bundles_post_ra>
// kernel: encoder_forward.3
= control target key start
LH: loop header
LB: loop body
LE: loop exit
PB: predicated region body
PF: predicated region fallthrough
CT: control target
= control target key end

     0   :  { %s330_s12 = smov 0   ;;  %s359_s0 = inlined_call_operand.vmem [shape: bf16[2,16,128], index: 0, kind: input, shape index: {}, may-alias: {0,3}]   ;;  %s360_s1 = inlined_call_operand.vmem [shape: f32[16,1], index: 1, kind: input, shape index: {}]   ;;  %s361_s2 = inlined_call_operand.vmem [shape: f32[16,1], index: 2, kind: input, shape index: {}]   ;;  %s362_s3 = inlined_call_operand.vmem [shape: bf16[2,16,128], index: 3, kind: output, shape index: {}, may-alias: {0,3}]  }
   0x1 LB: > { %s268_s13 = sadd.s32 4294967295, %s307_s12   ;;  %p272_p0 = scmp.ge.s32.totalorder %s307_s12, 1  ;;  %s307_s12 = sphi %s330_s12, %s13_s12  }
   0x2   : > { %p137_p1 = scmp.lt.s32.totalorder %s307_s12, 3 }
   0x4   : > { %p138_p2 = pnand %p272_p0, %p137_p1 }
   0x5   : > { %p161_p3 = scmp.lt.s32.totalorder (!%p138_p2), %s268_s13, 1 }
   0x6   : > { %141 = sbr.rel (%p138_p2) target bundleno = 146 (0x92), region = 32 }
   0xb   : > { %v189_v0 = vld [vmem:[%s361_s2] sm:$0xff]  ;;  %v309_v2 = vmov 0   ;;  %v190_v3 = vld [vmem:[%s361_s2 + $0x8] sm:$0xff]  ;;  %s364_s13 = smov (!%p161_p3, %s268_s13), 1 }
   0xc   : > { %v175_v1 = vld [vmem:[%s360_s1] sm:$0xff]  ;;  %300 = vset.pattern.permute.xlu1 %v309_v2  ;;  %299 = vset.pattern.permute.xlu0 %v309_v2  ;;  %v176_v4 = vld [vmem:[%s360_s1 + $0x8] sm:$0xff]  ;;  %s279_s22 = sshll.u32 %s364_s13, 3 }
   0xd   : > { %193 = vperm.xlu1 %300, %v189_v0   ;;  %179 = vperm.xlu0 %299, %v175_v1   ;;  %s165_s25 = scalar_lea.vmem %s359_s0, %s279_s22  ;;  %s170_s28 = scalar_lea.vmem %s362_s3, %s279_s22 }
   0xe   : > { %v282_v5 = vld [vmem:[%s165_s25] sm:$0xff]  }
   0xf   : > { %v283_v6 = vunpack.c.l.bf16 %v282_v5  ;;  %v284_v10 = vunpack.c.h.bf16 %v282_v5 }
  0x15   : > { %198 = vperm.xlu1 %300, %v190_v3   ;;  %184 = vperm.xlu0 %299, %v176_v4  }
  0x7f   : > { %v194_v7 = vpop.permute.xlu1 %193  ;;  %v180_v8 = vpop.permute.xlu0 %179 }
  0x80   : > { %v187_v9 = vmul.f32 %v283_v6, %v180_v8 }
  0x82   : > { %v201_v11 = vadd.f32 %v194_v7, %v187_v9 }
  0x84   : > { %v205_v15 = vmul.f32 0.01, %v201_v11  ;;  %vm203_vm0 = vcmp.ge.f32.partialorder %v201_v11, 0.0 }
  0x86   : > { %v207_v18 = vsel %vm203_vm0, %v201_v11, %v205_v15 }
  0x87   : > { %v185_v12 = vpop.permute.xlu0 %184  ;;  %v199_v14 = vpop.permute.xlu1 %198 }
  0x88   : > { %v188_v13 = vmul.f32 %v284_v10, %v185_v12 }
  0x8a   : > { %v202_v16 = vadd.f32 %v199_v14, %v188_v13 }
  0x8c   : > { %vm204_vm1 = vcmp.ge.f32.partialorder %v202_v16, 0.0  ;;  %v206_v17 = vmul.f32 0.01, %v202_v16 }
  0x8e   : > { %v208_v19 = vsel %vm204_vm1, %v202_v16, %v206_v17 }
  0x8f   : > { %v288_v20 = vpack.c.bf16 %v208_v19, %v207_v18 }
  0x91   : > { %289 = vst [vmem:[%s170_s28] sm:$0xff] %v288_v20  }
  0x92 PF: > { %s13_s12 = sadd.s32 1, %s307_s12  }
  0x93   : > { %p10_p4 = scmp.ge.s32.totalorder %s13_s12, 4  }
  0x95   :  { %12 = sbr.rel (!%p10_p4) target bundleno = 1 (0x1), region = 62 }

// kernel: encoder_forward.2
= control target key start
LH: loop header
LB: loop body
LE: loop exit
PB: predicated region body
PF: predicated region fallthrough
CT: control target
= control target key end

     0   :  { %s689_s18 = smov 0   ;;  %s740_s0 = inlined_call_operand.vmem [shape: bf16[2,32,256], index: 0, kind: input, shape index: {}]   ;;  %s741_s1 = inlined_call_operand.vmem [shape: bf16[4,16,32], index: 1, kind: input, shape index: {}]   ;;  %s742_s2 = inlined_call_operand.vmem [shape: f32[1,128], index: 2, kind: input, shape index: {}]   ;;  %s743_s3 = inlined_call_operand.vmem [shape: bf16[2,16,128], index: 3, kind: output, shape index: {0}]   ;;  %s744_s4 = inlined_call_operand.vmem [shape: f32[2,16,1], index: 4, kind: output, shape index: {1}]   ;;  %s745_s5 = inlined_call_operand.vmem [shape: f32[2,16,1], index: 5, kind: output, shape index: {2}]  }
   0x1 LB: > { %s562_s19 = sadd.s32 4294967295, %s654_s18   ;;  %p566_p0 = scmp.ge.s32.totalorder %s654_s18, 1  ;;  %s654_s18 = sphi %s689_s18, %s16_s18  }
   0x2   : > { %p192_p1 = scmp.lt.s32.totalorder %s654_s18, 3 }
   0x4   : > { %p193_p2 = pnand %p566_p0, %p192_p1 }
   0x5   : > { %p230_p3 = scmp.lt.s32.totalorder (!%p193_p2), %s562_s19, 1  ;;  %s656_s24 = smov (!%p193_p2), 118  }
   0x6   : > { %196 = sbr.rel (%p193_p2) target bundleno = 423 (0x1a7), region = 32  ;;  %s657_s25 = smov (!%p193_p2), 119  }
   0x7   : > { %s658_s26 = smov (!%p193_p2), 127  }
   0xb   : > { %s747_s19 = smov (!%p230_p3, %s562_s19), 1  ;;  %vm289_vm0 = vcmask 1039360   ;;  %v627_v15 = vld [vmem:[%s741_s1] sm:$0xff]  ;;  %vm294_vm1 = vcmask 261120   ;;  %vm352_vm2 = vcmask 973824   ;;  %vm392_vm3 = vcmask 965632  }
   0xc   : > { %s619_s20 = sshll.u32 %s747_s19, 5  ;;  %v629_v26 = vld [vmem:[%s741_s1 + $0x10] sm:$0xff]  ;;  %v628_v32 = vld [vmem:[%s741_s1 + $0x8] sm:$0xff]  ;;  %v630_v33 = vld [vmem:[%s741_s1 + $0x18] sm:$0xff]  ;;  %s620_s12 = sshll.u32 %s747_s19, 3  ;;  %vm430_vm4 = vcmask 7168  }
   0xd   : > { %s234_s23 = scalar_lea.vmem %s740_s0, %s619_s20  ;;  %v647_v39 = vld [vmem:[%s742_s2] ss:$0 sm:$0xff]  ;;  %s239_s15 = scalar_lea.vmem %s743_s3, %s620_s12 }
   0xe   : > { %v591_v0 = vld [vmem:[%s234_s23 + $0x10] sm:$0xf]  ;;  %v626_v1 = vld [vmem:[%s234_s23 + $0x14] sm:$0xf0]  ;;  %v583_v3 = vld [vmem:[%s234_s23] sm:$0xf] }
   0xf   : > { %v592_v2 = vor.u32 %v626_v1, %v591_v0  ;;  %v624_v4 = vld [vmem:[%s234_s23 + $0x4] sm:$0xf0]  ;;  %v625_v5 = vld [vmem:[%s234_s23 + $0x14] sm:$0xf]  ;;  %v593_v6 = vld [vmem:[%s234_s23 + $0x18] sm:$0xf0] }
  0x10   : > { %v584_v7 = vor.u32 %v624_v4, %v583_v3  ;;  %v596_v8 = vor.u32 %v625_v5, %v593_v6  ;;  %v623_v9 = vld [vmem:[%s234_s23 + $0x4] sm:$0xf]  ;;  %v585_v10 = vld [vmem:[%s234_s23 + $0x8] sm:$0xf0]  ;;  %s621_s16 = sshll.u32 %s747_s19, 4 }
  0x11   : > { %388 = vrot.lane.b32.xlu1 %v592_v2, %s656_s24  ;;  %348 = vrot.lane.b32.xlu0 %v592_v2, %s657_s25  ;;  %v588_v11 = vor.u32 %v623_v9, %v585_v10  ;;  %s244_s21 = scalar_lea.vmem %s744_s4, %s621_s16 }
  0x12   : > { %285 = vrot.lane.b32.xlu2 %v592_v2, %s658_s26  ;;  %328 = vmatpush.bf16.msra.mxu1 %v592_v2 }
  0x16   : > { %329 = vmatpush.bf16.msra.mxu1 %v584_v7 }
  0x19   : > { %390 = vrot.lane.b32.xlu1 %v596_v8, %s656_s24  ;;  %350 = vrot.lane.b32.xlu0 %v596_v8, %s657_s25 }
  0x1a   : > { %287 = vrot.lane.b32.xlu2 %v596_v8, %s658_s26  ;;  %602 = vmatmul.msk.bf16.vlgmr.msra.gmra.mxu1 %vm294_vm1, %v627_v15 }
  0x21   : > { %344 = vrot.lane.b32.xlu0 %v584_v7, %s657_s25  ;;  %346 = vrot.lane.b32.xlu1 %v588_v11, %s657_s25 }
  0x22   : > { %384 = vrot.lane.b32.xlu2 %v584_v7, %s656_s24 }
  0x29   : > { %386 = vrot.lane.b32.xlu0 %v588_v11, %s656_s24  ;;  %281 = vrot.lane.b32.xlu1 %v584_v7, %s658_s26  ;;  %s249_s24 = scalar_lea.vmem %s745_s5, %s621_s16 }
  0x2a   : > { %283 = vrot.lane.b32.xlu2 %v588_v11, %s658_s26 }
  0x6c   : > { %v286_v12 = vpop.permute.xlu2 %285 }
  0x74   : > { %v288_v13 = vpop.permute.xlu2 %287 }
  0x75   : > { %v291_v14 = vsel %vm289_vm0, %v286_v12, %v288_v13 }
  0x76   : > { %304 = vmatpush.bf16.msra.mxu0 %v291_v14 }
  0x7c   : > { %v385_v22 = vpop.permute.xlu2 %384 }
  0x83   : > { %v389_v16 = vpop.permute.xlu1 %388  ;;  %v349_v17 = vpop.permute.xlu0 %348 }
  0x84   : > { %v284_v27 = vpop.permute.xlu2 %283 }
  0x8b   : > { %v391_v18 = vpop.permute.xlu1 %390  ;;  %v351_v19 = vpop.permute.xlu0 %350 }
  0x8c   : > { %v354_v20 = vsel %vm352_vm2, %v349_v17, %v351_v19  ;;  %v394_v21 = vsel %vm392_vm3, %v389_v16, %v391_v18 }
  0x8d   : > { %366 = vmatpush.bf16.msra.mxu2 %v354_v20  ;;  %406 = vmatpush.bf16.msra.mxu3 %v394_v21 }
  0x93   : > { %v345_v23 = vpop.permute.xlu0 %344  ;;  %v347_v24 = vpop.permute.xlu1 %346 }
  0x94   : > { %v353_v25 = vsel %vm352_vm2, %v345_v23, %v347_v24 }
  0x95   : > { %367 = vmatpush.bf16.msra.mxu2 %v353_v25 }
  0x97   : > { %v331_v34 = vpop.f32.mrf.mxu1 }
  0x98   : > { %609 = vmatmul.msk.bf16.vlgmr.msra.gmra.mxu2 %vm294_vm1, %v629_v26 }
  0x9b   : > { %v387_v28 = vpop.permute.xlu0 %386  ;;  %v282_v29 = vpop.permute.xlu1 %281 }
  0x9c   : > { %v290_v30 = vsel %vm289_vm0, %v282_v29, %v284_v27  ;;  %v393_v31 = vsel %vm392_vm3, %v385_v22, %v387_v28 }
  0x9d   : > { %305 = vmatpush.bf16.msra.mxu0 %v290_v30  ;;  %407 = vmatpush.bf16.msra.mxu3 %v393_v31 }
  0x9f   : > { %v333_v42 = vpop.f32.mrf.mxu1 }
  0xa0   : > { %597 = vmatmul.msk.bf16.vlgmr.msra.gmra.mxu0 %vm294_vm1, %v628_v32  ;;  %616 = vmatmul.msk.bf16.vlgmr.msra.gmra.mxu3 %vm294_vm1, %v630_v33 }
 0x11b   : > { %v369_v37 = vpop.f32.mrf.mxu2 }
 0x11d   : > { %v307_v35 = vpop.f32.mrf.mxu0 }
 0x11e   : > { %v332_v36 = vadd.f32 %v331_v34, %v307_v35 }
 0x120   : > { %v374_v38 = vadd.f32 %v369_v37, %v332_v36 }
 0x123   : > { %v409_v40 = vpop.f32.mrf.mxu3  ;;  %v371_v47 = vpop.f32.mrf.mxu2 }
 0x124   : > { %v414_v41 = vadd.f32 %v409_v40, %v374_v38 }
 0x125   : > { %v309_v43 = vpop.f32.mrf.mxu0 }
 0x126   : > { %v334_v44 = vadd.f32 %v333_v42, %v309_v43  ;;  %v424_v45 = vmul.f32 %v647_v39, %v414_v41 }
 0x128   : > { %426 = vadd.xlane.f32.xlu0 %v424_v45  ;;  %v433_v46 = vmul.f32 %v424_v45, %v414_v41  ;;  %v375_v48 = vadd.f32 %v371_v47, %v334_v44 }
 0x12a   : > { %435 = vadd.xlane.f32.xlu2 %v433_v46 }
 0x12b   : > { %v411_v49 = vpop.f32.mrf.mxu3 }
 0x12c   : > { %v415_v50 = vadd.f32 %v411_v49, %v375_v48 }
 0x12e   : > { %v634_v51 = vpack.c.bf16 %v415_v50, %v414_v41  ;;  %v425_v52 = vmul.f32 %v647_v39, %v415_v50 }
 0x130   : > { %635 = vst [vmem:[%s239_s15] sm:$0xff] %v634_v51   ;;  %428 = vadd.xlane.f32.xlu1 %v425_v52  ;;  %v434_v53 = vmul.f32 %v425_v52, %v415_v50 }
 0x132   : > { %437 = vadd.xlane.f32.xlu2 %v434_v53 }
 0x19b   : > { %v427_v54 = vpop.xlane.xlu0 %426 }
 0x19c   : > { %431 = vst.msk [vmem:[%s244_s21] sm:$0xff] %vm430_vm4, %v427_v54 }
 0x19d   : > { %v436_v55 = vpop.xlane.xlu2 %435 }
 0x19e   : > { %439 = vst.msk [vmem:[%s249_s24] sm:$0xff] %vm430_vm4, %v436_v55 }
 0x1a3   : > { %v429_v56 = vpop.xlane.xlu1 %428 }
 0x1a4   : > { %432 = vst.msk [vmem:[%s244_s21 + $0x8] sm:$0xff] %vm430_vm4, %v429_v56 }
 0x1a5   : > { %v438_v57 = vpop.xlane.xlu2 %437 }
 0x1a6   : > { %440 = vst.msk [vmem:[%s249_s24 + $0x8] sm:$0xff] %vm430_vm4, %v438_v57 }
 0x1a7 PF: > { %s16_s18 = sadd.s32 1, %s654_s18  }
 0x1a8   : > { %p13_p4 = scmp.ge.s32.totalorder %s16_s18, 4  }
 0x1aa   :  { %15 = sbr.rel (!%p13_p4) target bundleno = 1 (0x1), region = 89 }

</bundles_post_ra>
